<compile_context>
chip_gen: v6e
topology: v6e:2x2x1
jax: 0.10.0
libtpu: 0.0.40
codegen_flags: <defaults>
</compile_context>

<pallas_src>
import functools
import math

import jax
import jax.numpy as jnp
from jax.experimental import pallas as pl
from jax.experimental.pallas import tpu as pltpu


_MIB = 1024 * 1024
_DEFAULT_VMEM_LIMIT = 48 * _MIB      # > 32 MiB scoped default, < v7x 64 MiB/TC
_VMEM_BUDGET_FRACTION = 0.8          # leave headroom below the limit


# ---------------------------------------------------------------------------
# Small helpers
# ---------------------------------------------------------------------------

def _round_up(x, m):
    return ((x + m - 1) // m) * m


def _apply_activation(y, activation):
    if activation is None:
        return y
    if activation == "relu":
        return jnp.maximum(y, 0.0)
    if activation == "leakyrelu":            # PyTorch default negative_slope=0.01
        return jnp.where(y >= 0.0, y, 0.01 * y)
    if activation == "elu":                  # PyTorch default alpha=1.0
        return jnp.where(y >= 0.0, y, jnp.expm1(y))
    raise ValueError(f"unsupported activation: {activation!r}")


def _maybe_cast(v, dtype):
    return v if dtype is None or v.dtype == dtype else v.astype(dtype)


def _pick_tile_m(M, tm):
    """M tile: multiple of 8 (or full M).  When M > 8 make >= 2 grid steps so
    the 'parallel' M axis can be split across both v7x TensorCores."""
    if M > tm:
        return tm
    if M <= 8:
        return M
    return min(M, _round_up(pl.cdiv(M, 2), 8))


def _pick_tile_k(k_dim, target, align=128):
    """K tile must divide K exactly (a masked partial K block would pollute the
    accumulation).  Largest multiple of `align` <= target dividing K, or K."""
    if k_dim <= target:
        return k_dim
    t = (target // align) * align
    while t >= align:
        if k_dim % t == 0:
            return t
        t -= align
    return k_dim  # fallback: K fully resident (correct, bigger VMEM footprint)


def _fc_vmem_estimate(tm, tn, tk, x_bytes, w_bytes):
    # double-buffered x / w / bias input blocks + double-buffered output + f32 acc
    return (2 * (tm * tk * x_bytes + tk * tn * w_bytes + tn * 4)
            + 2 * tm * tn * 4
            + tm * tn * 4)


def _fused_vmem_estimate(tm, dims, n_last, x_bytes, w_bytes):
    L = len(dims) - 1
    w_elems = sum(dims[l] * (dims[l + 1] if l < L - 1 else n_last) for l in range(L))
    b_elems = sum(dims[1:L]) + n_last
    est = 2 * tm * dims[0] * x_bytes                 # x tile (double-buffered)
    est += 2 * (w_elems * w_bytes + b_elems * 4)     # resident weights / biases
    est += 2 * tm * n_last * 4                       # output tile (double-buffered)
    est += 3 * tm * max(max(dims), n_last) * 4       # live intermediate activations
    return est


# ---------------------------------------------------------------------------
# Kernels
# ---------------------------------------------------------------------------

def _fc_kernel(x_ref, w_ref, b_ref, o_ref, acc_ref, *, activation, mxu_dtype):
    # grid = (m_tiles, n_tiles, k_tiles); reduction axis (k) is last.
    k = pl.program_id(2)

    @pl.when(k == 0)
    def _init():
        # Bias folded into the accumulator init (saves a full-tile add later).
        acc_ref[...] = jnp.broadcast_to(b_ref[...].astype(jnp.float32),
                                        acc_ref.shape)

    lhs = _maybe_cast(x_ref[...], mxu_dtype)
    rhs = _maybe_cast(w_ref[...], mxu_dtype)
    acc_ref[...] += jnp.dot(lhs, rhs, preferred_element_type=jnp.float32)

    @pl.when(k == pl.num_programs(2) - 1)
    def _finalize():
        o_ref[...] = _apply_activation(acc_ref[...], activation).astype(o_ref.dtype)


def _mlp_fused_kernel(*refs, num_layers, activation, mxu_dtype):
    # refs = (x_ref, w0, b0, w1, b1, ..., o_ref); all weights are VMEM-resident.
    x_ref, o_ref = refs[0], refs[-1]
    h = x_ref[...]
    for l in range(num_layers):
        w = refs[1 + 2 * l][...]
        b = refs[2 + 2 * l][...]
        y = jnp.dot(_maybe_cast(h, mxu_dtype), _maybe_cast(w, mxu_dtype),
                    preferred_element_type=jnp.float32)
        h = _apply_activation(y + b.astype(jnp.float32), activation)
    o_ref[...] = h.astype(o_ref.dtype)


# ---------------------------------------------------------------------------
# Wrappers
# ---------------------------------------------------------------------------

def fc_forward(x, w_t, bias, activation=None, *, tm=512, tn=512, tk=1024,
               mxu_dtype=jnp.bfloat16, prefer_resident=True,
               vmem_limit_bytes=_DEFAULT_VMEM_LIMIT):
    """One FC layer.  x: (..., K), w_t: (K, N) (pre-transposed), bias: (N,)."""
    in_shape = x.shape
    K = in_shape[-1]
    N = w_t.shape[1]
    x2d = x.reshape(-1, K) if len(in_shape) > 2 else x
    M = x2d.shape[0]

    w_t = _maybe_cast(w_t, mxu_dtype)           # cast small weight once (HBM half)
    b2d = bias.astype(jnp.float32).reshape(1, N)

    x_bytes = jnp.dtype(x2d.dtype).itemsize
    w_bytes = jnp.dtype(w_t.dtype).itemsize
    budget = int(_VMEM_BUDGET_FRACTION * vmem_limit_bytes)

    tm_eff = _pick_tile_m(M, tm)

    # Weight residency: keep the whole (K, N) weight in VMEM across all M tiles
    # -> weight/bias DMA'd from HBM exactly once, x streamed once.
    resident = (prefer_resident
                and 2 * K * N * w_bytes <= budget // 3
                and _fc_vmem_estimate(tm_eff, N, K, x_bytes, w_bytes) <= budget)
    if resident:
        tn_eff, tk_eff = N, K
    else:
        tn_eff = N if N <= tn else tn
        tk_eff = _pick_tile_k(K, tk)

    # VMEM guard (v7x only has 64 MiB/TC): shrink tiles until the estimate fits.
    while (_fc_vmem_estimate(tm_eff, tn_eff, tk_eff, x_bytes, w_bytes) > budget
           and tm_eff > 8):
        tm_eff = max(8, (tm_eff // 2 // 8) * 8)
    while (_fc_vmem_estimate(tm_eff, tn_eff, tk_eff, x_bytes, w_bytes) > budget
           and tn_eff > 128):
        tn_eff = max(128, (tn_eff // 2 // 128) * 128)
    while (_fc_vmem_estimate(tm_eff, tn_eff, tk_eff, x_bytes, w_bytes) > budget
           and tk_eff > 128):
        new_tk = _pick_tile_k(K, max(128, tk_eff // 2))
        if new_tk >= tk_eff:
            break
        tk_eff = new_tk

    grid_m = pl.cdiv(M, tm_eff)
    grid_n = pl.cdiv(N, tn_eff)
    grid_k = pl.cdiv(K, tk_eff)      # tk_eff divides K (or tk_eff == K)

    kernel = functools.partial(_fc_kernel, activation=activation,
                               mxu_dtype=mxu_dtype)

    y2d = pl.pallas_call(
        kernel,
        out_shape=jax.ShapeDtypeStruct((M, N), x.dtype),
        grid_spec=pltpu.PrefetchScalarGridSpec(
            num_scalar_prefetch=0,
            grid=(grid_m, grid_n, grid_k),
            in_specs=[
                pl.BlockSpec((tm_eff, tk_eff), lambda i, j, k: (i, k)),   # x
                pl.BlockSpec((tk_eff, tn_eff), lambda i, j, k: (k, j)),   # w_t
                pl.BlockSpec((1, tn_eff), lambda i, j, k: (0, j)),        # bias
            ],
            out_specs=pl.BlockSpec((tm_eff, tn_eff), lambda i, j, k: (i, j)),
            scratch_shapes=[pltpu.VMEM((tm_eff, tn_eff), jnp.float32)],
        ),
        compiler_params=pltpu.CompilerParams(
            dimension_semantics=("parallel", "parallel", "arbitrary"),
            vmem_limit_bytes=vmem_limit_bytes,
        ),
    )(x2d, w_t, b2d)

    if len(in_shape) > 2:
        return y2d.reshape(list(in_shape[:-1]) + [N])
    return y2d


def mlp_forward_fused(x, params, activation=None, *, tm=512,
                      mxu_dtype=jnp.bfloat16,
                      vmem_limit_bytes=_DEFAULT_VMEM_LIMIT,
                      pad_lane_output=True):
    """Whole MLP in one pallas_call: grid over M only, all weights resident in
    VMEM, intermediate activations never leave VMEM."""
    in_shape = x.shape
    K0 = in_shape[-1]
    x2d = x.reshape(-1, K0) if len(in_shape) > 2 else x
    M = x2d.shape[0]

    L = len(params)
    dims = [K0] + [w.shape[1] for w, _ in params]
    N_out = dims[-1]
    N_pad = _round_up(N_out, 128) if pad_lane_output else N_out

    flat_params = []
    for l, (w_t, b) in enumerate(params):
        w_t = _maybe_cast(w_t, mxu_dtype)
        b = b.astype(jnp.float32)
        if l == L - 1 and N_pad != N_out:
            # Lane-dense output: pad last layer's columns with zeros (harmless:
            # activation(0 + 0) == 0 for None/relu/leakyrelu/elu); slice after.
            w_t = jnp.pad(w_t, ((0, 0), (0, N_pad - N_out)))
            b = jnp.pad(b, (0, N_pad - N_out))
        flat_params.extend([w_t, b.reshape(1, -1)])

    tm_eff = _pick_tile_m(M, tm)
    grid_m = pl.cdiv(M, tm_eff)

    in_specs = [pl.BlockSpec((tm_eff, K0), lambda i: (i, 0))]       # x tile
    for l in range(L):
        k_l = dims[l]
        n_l = N_pad if l == L - 1 else dims[l + 1]
        in_specs.append(pl.BlockSpec((k_l, n_l), lambda i: (0, 0)))  # weight (resident)
        in_specs.append(pl.BlockSpec((1, n_l), lambda i: (0, 0)))    # bias   (resident)

    kernel = functools.partial(_mlp_fused_kernel, num_layers=L,
                               activation=activation, mxu_dtype=mxu_dtype)

    y2d = pl.pallas_call(
        kernel,
        out_shape=jax.ShapeDtypeStruct((M, N_pad), x.dtype),
        grid_spec=pltpu.PrefetchScalarGridSpec(
            num_scalar_prefetch=0,
            grid=(grid_m,),
            in_specs=in_specs,
            out_specs=pl.BlockSpec((tm_eff, N_pad), lambda i: (i, 0)),
        ),
        compiler_params=pltpu.CompilerParams(
            dimension_semantics=("parallel",),
            vmem_limit_bytes=vmem_limit_bytes,
        ),
    )(x2d, *flat_params)

    if N_pad != N_out:
        y2d = y2d[:, :N_out]
    if len(in_shape) > 2:
        return y2d.reshape(list(in_shape[:-1]) + [N_out])
    return y2d


def mlp_forward(x, params, activation=None, *, fuse=True, tm=512, tn=512, tk=1024,
                mxu_dtype=jnp.bfloat16, prefer_resident=True,
                vmem_limit_bytes=_DEFAULT_VMEM_LIMIT, pad_lane_output=True):
    """MLP = chain of FC layers. params: list of (w_t, bias) with w_t: (K, N)."""
    if fuse:
        dims = [x.shape[-1]] + [w.shape[1] for w, _ in params]
        N_out = dims[-1]
        N_pad = _round_up(N_out, 128) if pad_lane_output else N_out
        M = int(math.prod(x.shape[:-1])) if x.ndim > 1 else 1
        tm_eff = _pick_tile_m(M, tm)
        x_bytes = jnp.dtype(x.dtype).itemsize
        w_bytes = jnp.dtype(mxu_dtype).itemsize if mxu_dtype is not None \
            else jnp.dtype(params[0][0].dtype).itemsize
        budget = int(_VMEM_BUDGET_FRACTION * vmem_limit_bytes)
        if _fused_vmem_estimate(tm_eff, dims, N_pad, x_bytes, w_bytes) <= budget:
            return mlp_forward_fused(
                x, params, activation=activation, tm=tm, mxu_dtype=mxu_dtype,
                vmem_limit_bytes=vmem_limit_bytes, pad_lane_output=pad_lane_output)

    y = x
    for w_t, b in params:
        y = fc_forward(y, w_t, b, activation=activation, tm=tm, tn=tn, tk=tk,
                       mxu_dtype=mxu_dtype, prefer_resident=prefer_resident,
                       vmem_limit_bytes=vmem_limit_bytes)
    return y


# ---------------------------------------------------------------------------
# Params / reference
# ---------------------------------------------------------------------------

def init_mlp_params(key, in_dim, out_dim, hidden_dim, num_layers=3):
    """nn.Linear-style init (uniform +/- 1/sqrt(fan_in)); weights stored
    pre-transposed to (in_dim, out_dim) so the forward never re-transposes."""
    if not isinstance(hidden_dim, (list, tuple)):
        hidden_dim = [hidden_dim] * (num_layers - 1)
    dims = [in_dim] + list(hidden_dim) + [out_dim]
    params = []
    for i in range(len(dims) - 1):
        key, kw, kb = jax.random.split(key, 3)
        fan_in, fan_out = dims[i], dims[i + 1]
        bound = 1.0 / (fan_in ** 0.5)
        w_t = jax.random.uniform(kw, (fan_in, fan_out), jnp.float32, -bound, bound)
        b = jax.random.uniform(kb, (fan_out,), jnp.float32, -bound, bound)
        params.append((w_t, b))
    return params


def mlp_reference(x, params, activation=None, mxu_dtype=None):
    """Pure-JAX reference. mxu_dtype=jnp.bfloat16 mimics the kernel's bf16
    matmul / f32 accumulation; None is the exact fp32 PyTorch semantics."""
    in_shape = x.shape
    y = x.reshape(-1, in_shape[-1]) if len(in_shape) > 2 else x
    for w_t, b in params:
        if mxu_dtype is not None:
            z = jnp.dot(y.astype(mxu_dtype), w_t.astype(mxu_dtype),
                        preferred_element_type=jnp.float32) + b
        else:
            z = y @ w_t + b
        y = _apply_activation(z, activation)
    if len(in_shape) > 2:
        y = y.reshape(list(in_shape[:-1]) + [y.shape[-1]])
    return y


# ---------------------------------------------------------------------------
# Self-test
# ---------------------------------------------------------------------------

if __name__ == "__main__":
    key = jax.random.PRNGKey(0)
    k_x, k_p, k_x2, k_p2 = jax.random.split(key, 4)

    # 1) Small 3-layer MLP on a rank-3 input (module's view/reshape path).
    #    Exercises the fused whole-MLP kernel + lane-dense output padding
    #    (out_dim=48 < 128) + 2-tile M split (M = 2*8 = 16).
    batch, seq, in_dim, hidden_dim, out_dim = 2, 8, 32, 64, 48
    x = jax.random.normal(k_x, (batch, seq, in_dim), jnp.float32)
    params = init_mlp_params(k_p, in_dim, out_dim, hidden_dim, num_layers=3)

    for act in (None, "relu", "leakyrelu", "elu"):
        y = jax.block_until_ready(mlp_forward(x, params, activation=act))
        y_ref_bf = mlp_reference(x, params, activation=act, mxu_dtype=jnp.bfloat16)
        y_ref_f32 = mlp_reference(x, params, activation=act)
        assert y.shape == (batch, seq, out_dim)
        assert jnp.allclose(y, y_ref_bf, atol=1e-4, rtol=1e-4), f"mismatch vs bf16 ref ({act})"
        assert jnp.allclose(y, y_ref_f32, atol=5e-2, rtol=5e-2), f"mismatch vs f32 ref ({act})"

    # 2) 2-D case exercising the per-layer tiled path with K accumulation and
    #    M/N tiling (fusion + weight residency disabled on purpose).
    M2, K2, H2, O2 = 256, 256, 256, 128
    x2 = jax.random.normal(k_x2, (M2, K2), jnp.float32)
    params2 = init_mlp_params(k_p2, K2, O2, H2, num_layers=3)
    y2 = jax.block_until_ready(
        mlp_forward(x2, params2, activation="relu", fuse=False,
                    prefer_resident=False, tm=128, tn=128, tk=128))
    y2_ref = mlp_reference(x2, params2, activation="relu", mxu_dtype=jnp.bfloat16)
    assert y2.shape == (M2, O2)
    assert jnp.allclose(y2, y2_ref, atol=1e-3, rtol=1e-3), "mismatch (tiled path)"

    # 3) Same shapes through the per-layer weight-resident path (fuse off,
    #    residency on -> grid (grid_m, 1, 1), weight DMA'd once per layer).
    y3 = jax.block_until_ready(
        mlp_forward(x2, params2, activation="elu", fuse=False))
    y3_ref = mlp_reference(x2, params2, activation="elu", mxu_dtype=jnp.bfloat16)
    assert jnp.allclose(y3, y3_ref, atol=1e-3, rtol=1e-3), "mismatch (resident path)"

    print("KERNEL_OK")
</pallas_src>

<mosaic_0001>
module attributes {stable_mosaic.version = 11 : i64} {
  func.func @_mlp_fused_kernel(%arg0: i32, %arg1: memref<8x32xf32, #tpu.memory_space<vmem>>, %arg2: memref<32x64xbf16, #tpu.memory_space<vmem>>, %arg3: memref<1x64xf32, #tpu.memory_space<vmem>>, %arg4: memref<64x64xbf16, #tpu.memory_space<vmem>>, %arg5: memref<1x64xf32, #tpu.memory_space<vmem>>, %arg6: memref<64x128xbf16, #tpu.memory_space<vmem>>, %arg7: memref<1x128xf32, #tpu.memory_space<vmem>>, %arg8: memref<8x128xf32, #tpu.memory_space<vmem>>) attributes {dimension_semantics = [#tpu.dimension_semantics<parallel>], iteration_bounds = array<i64: 2>, scalar_prefetch = 0 : i64, scratch_operands = 0 : i64, tpu.core_type = #tpu.core_type<tc>, window_params = [{transform_indices = @transform_0, window_bounds = array<i64: 8, 32>}, {pipeline_mode = #tpu.pipeline_mode<synchronous>, transform_indices = @transform_1, window_bounds = array<i64: 32, 64>}, {pipeline_mode = #tpu.pipeline_mode<synchronous>, transform_indices = @transform_2, window_bounds = array<i64: 1, 64>}, {pipeline_mode = #tpu.pipeline_mode<synchronous>, transform_indices = @transform_3, window_bounds = array<i64: 64, 64>}, {pipeline_mode = #tpu.pipeline_mode<synchronous>, transform_indices = @transform_4, window_bounds = array<i64: 1, 64>}, {pipeline_mode = #tpu.pipeline_mode<synchronous>, transform_indices = @transform_5, window_bounds = array<i64: 64, 128>}, {pipeline_mode = #tpu.pipeline_mode<synchronous>, transform_indices = @transform_6, window_bounds = array<i64: 1, 128>}, {transform_indices = @transform_7, window_bounds = array<i64: 8, 128>}]} {
    %c0 = arith.constant 0 : index
    %c0_0 = arith.constant 0 : index
    %0 = vector.load %arg1[%c0, %c0_0] : memref<8x32xf32, #tpu.memory_space<vmem>>, vector<8x32xf32>
    %c0_1 = arith.constant 0 : index
    %c0_2 = arith.constant 0 : index
    %1 = vector.load %arg2[%c0_1, %c0_2] : memref<32x64xbf16, #tpu.memory_space<vmem>>, vector<32x64xbf16>
    %c0_3 = arith.constant 0 : index
    %c0_4 = arith.constant 0 : index
    %2 = vector.load %arg3[%c0_3, %c0_4] : memref<1x64xf32, #tpu.memory_space<vmem>>, vector<1x64xf32>
    %3 = arith.truncf %0 : vector<8x32xf32> to vector<8x32xbf16>
    %cst = arith.constant dense<0.000000e+00> : vector<8x64xf32>
    %4 = tpu.matmul %3, %1, %cst {dimension_numbers = #tpu.dot_dimension_numbers<[1], [0], [0], [1], [0, 0, 1, 1], [], []>} : vector<8x32xbf16>, vector<32x64xbf16>, vector<8x64xf32> -> vector<8x64xf32>
    %5 = vector.broadcast %2 : vector<1x64xf32> to vector<8x64xf32>
    %6 = arith.addf %4, %5 : vector<8x64xf32>
    %c0_5 = arith.constant 0 : index
    %c0_6 = arith.constant 0 : index
    %7 = vector.load %arg4[%c0_5, %c0_6] : memref<64x64xbf16, #tpu.memory_space<vmem>>, vector<64x64xbf16>
    %c0_7 = arith.constant 0 : index
    %c0_8 = arith.constant 0 : index
    %8 = vector.load %arg5[%c0_7, %c0_8] : memref<1x64xf32, #tpu.memory_space<vmem>>, vector<1x64xf32>
    %9 = arith.truncf %6 : vector<8x64xf32> to vector<8x64xbf16>
    %cst_9 = arith.constant dense<0.000000e+00> : vector<8x64xf32>
    %10 = tpu.matmul %9, %7, %cst_9 {dimension_numbers = #tpu.dot_dimension_numbers<[1], [0], [0], [1], [0, 0, 1, 1], [], []>} : vector<8x64xbf16>, vector<64x64xbf16>, vector<8x64xf32> -> vector<8x64xf32>
    %11 = vector.broadcast %8 : vector<1x64xf32> to vector<8x64xf32>
    %12 = arith.addf %10, %11 : vector<8x64xf32>
    %c0_10 = arith.constant 0 : index
    %c0_11 = arith.constant 0 : index
    %13 = vector.load %arg6[%c0_10, %c0_11] : memref<64x128xbf16, #tpu.memory_space<vmem>>, vector<64x128xbf16>
    %c0_12 = arith.constant 0 : index
    %c0_13 = arith.constant 0 : index
    %14 = vector.load %arg7[%c0_12, %c0_13] : memref<1x128xf32, #tpu.memory_space<vmem>>, vector<1x128xf32>
    %15 = arith.truncf %12 : vector<8x64xf32> to vector<8x64xbf16>
    %cst_14 = arith.constant dense<0.000000e+00> : vector<8x128xf32>
    %16 = tpu.matmul %15, %13, %cst_14 {dimension_numbers = #tpu.dot_dimension_numbers<[1], [0], [0], [1], [0, 0, 1, 1], [], []>} : vector<8x64xbf16>, vector<64x128xbf16>, vector<8x128xf32> -> vector<8x128xf32>
    %17 = vector.broadcast %14 : vector<1x128xf32> to vector<8x128xf32>
    %18 = arith.addf %16, %17 : vector<8x128xf32>
    %c0_15 = arith.constant 0 : index
    %c0_16 = arith.constant 0 : index
    %19 = vector.load %arg8[%c0_15, %c0_16] : memref<8x128xf32, #tpu.memory_space<vmem>>, vector<8x128xf32>
    tpu.vector_store %arg8[%c0_15, %c0_16], %18 {strides = array<i32>} : memref<8x128xf32, #tpu.memory_space<vmem>>, vector<8x128xf32>,
    return
  }
  func.func @transform_0(%arg0: i32) -> (i32, i32) {
    %c0_i32 = arith.constant 0 : i32
    %c0_i32_0 = arith.constant 0 : i32
    return %arg0, %c0_i32 : i32, i32
  }
  func.func @transform_1(%arg0: i32) -> (i32, i32) {
    %c0_i32 = arith.constant 0 : i32
    %c0_i32_0 = arith.constant 0 : i32
    %c0_i32_1 = arith.constant 0 : i32
    return %c0_i32, %c0_i32_0 : i32, i32
  }
  func.func @transform_2(%arg0: i32) -> (i32, i32) {
    %c0_i32 = arith.constant 0 : i32
    %c0_i32_0 = arith.constant 0 : i32
    %c0_i32_1 = arith.constant 0 : i32
    return %c0_i32, %c0_i32_0 : i32, i32
  }
  func.func @transform_3(%arg0: i32) -> (i32, i32) {
    %c0_i32 = arith.constant 0 : i32
    %c0_i32_0 = arith.constant 0 : i32
    %c0_i32_1 = arith.constant 0 : i32
    return %c0_i32, %c0_i32_0 : i32, i32
  }
  func.func @transform_4(%arg0: i32) -> (i32, i32) {
    %c0_i32 = arith.constant 0 : i32
    %c0_i32_0 = arith.constant 0 : i32
    %c0_i32_1 = arith.constant 0 : i32
    return %c0_i32, %c0_i32_0 : i32, i32
  }
  func.func @transform_5(%arg0: i32) -> (i32, i32) {
    %c0_i32 = arith.constant 0 : i32
    %c0_i32_0 = arith.constant 0 : i32
    %c0_i32_1 = arith.constant 0 : i32
    return %c0_i32, %c0_i32_0 : i32, i32
  }
  func.func @transform_6(%arg0: i32) -> (i32, i32) {
    %c0_i32 = arith.constant 0 : i32
    %c0_i32_0 = arith.constant 0 : i32
    %c0_i32_1 = arith.constant 0 : i32
    return %c0_i32, %c0_i32_0 : i32, i32
  }
  func.func @transform_7(%arg0: i32) -> (i32, i32) {
    %c0_i32 = arith.constant 0 : i32
    %c0_i32_0 = arith.constant 0 : i32
    return %arg0, %c0_i32 : i32, i32
  }
}

</mosaic_0001>

<bundles_post_ra>
// kernel: tpu_custom_call.1
= control target key start
LH: loop header
LB: loop body
LE: loop exit
PB: predicated region body
PF: predicated region fallthrough
CT: control target
= control target key end

     0   :  { %s1293_s0 = inlined_call_operand.hbm [shape: f32[16,32], index: 0, kind: input, shape index: {}]   ;;  %s1294_s1 = inlined_call_operand.hbm [shape: bf16[32,64], index: 1, kind: input, shape index: {}]   ;;  %s1295_s2 = inlined_call_operand.vmem [shape: f32[1,64], index: 2, kind: input, shape index: {}]   ;;  %s1296_s3 = inlined_call_operand.hbm [shape: bf16[64,64], index: 3, kind: input, shape index: {}]   ;;  %s1297_s4 = inlined_call_operand.vmem [shape: f32[1,64], index: 4, kind: input, shape index: {}]   ;;  %s1298_s5 = inlined_call_operand.hbm [shape: bf16[64,128], index: 5, kind: input, shape index: {}]   ;;  %s1299_s6 = inlined_call_operand.vmem [shape: f32[1,128], index: 6, kind: input, shape index: {}]   ;;  %s1300_s7 = inlined_call_operand.hbm [shape: f32[16,128], index: 7, kind: output, shape index: {}]  }
   0x1   :  { %1305 = sst [smem:[#allocation15_spill]] %s1294_s1 }
   0x2   :  { %1306 = sst [smem:[#allocation16_spill]] %s1296_s3 }
   0x3   :  { %12 = vsyncpa [#allocation3], 0 }
   0x4   :  { %14 = vsyncpa [#allocation3 + $0x1], 0 }
   0x5   :  { %15 = vsyncpa [#allocation6], 0 }
   0x6   :  { %16 = vsyncpa [#allocation9], 0 }
   0x7   :  { %17 = vsyncpa [#allocation4], 0 }
   0x8   :  { %19 = vsyncpa [#allocation4 + $0x1], 0  ;;  %s1088_s24 = smov 0   ;;  %s1090_s25 = smov 0  }
   0x9   :  { %s1092_s26 = smov 0   ;;  %s1094_s27 = smov 0  }
   0xa LB: > { %s1109_s28 = sadd.s32 4294967295, %s1037_s27   ;;  %s689_s29 = sadd.s32 4294967294, %s1037_s27   ;;  %s1037_s27 = sphi %s1094_s27, %s1328_s27   ;;  %s1033_s26 = sphi %s1092_s26, %s1327_s26   ;;  %s1029_s25 = sphi %s1090_s25, %s1326_s25   ;;  %s1025_s24 = sphi %s1088_s24, %s1325_s24  }
   0xb   : > { %p45_p0 = scmp.ne.s32.totalorder %s1029_s25, %s1025_s24  ;;  %p1301_p1 = scmp.eq.s32.totalorder %s1109_s28, 0 }
   0xc   : > { %p201_p3 = scmp.eq.s32.totalorder %s689_s29, 1  ;;  %p690_p5 = scmp.ge.s32.totalorder %s1037_s27, 1 }
   0xd   : > { %p1118_p4 = por %p1301_p1, %p45_p0  ;;  %p208_p7 = scmp.lt.s32.totalorder %s1037_s27, 3 }
   0xe   : > { %p1123_p6 = por %p201_p3, %p45_p0  ;;  %s1039_s10 = smov [#allocation5]  }
   0xf   : > { %s1307_s30 = scalar_select %p1118_p4, 1, 0 }
  0x10   : > { %s1308_s8 = scalar_select %p1123_p6, 1, 0 }
  0x11   : > { %p1128_p8 = pnand %p690_p5, %p208_p7  ;;  %s220_s11 = sshll.u32 %s1039_s10, 4  ;;  %s221_s11 = int_to_ptr.vmem [resolvable:$true] %s220_s11 }
  0x12   : > { %s1040_s13 = smov [#allocation7]   ;;  %s1041_s15 = smov [#allocation8]  }
  0x13   : > { %s1309_s9 = scalar_select %p1128_p8, 1, 0 }
  0x14   : > { %p784_p9 = pneg %p1128_p8  ;;  %s236_s14 = sshll.u32 %s1040_s13, 4  ;;  %s237_s14 = int_to_ptr.vmem [resolvable:$true] %s236_s14 }
  0x15   : > { %s252_s16 = sshll.u32 %s1041_s15, 4  ;;  %s870_s17 = scalar_lea.vmem %s221_s11, 256  ;;  %s253_s16 = int_to_ptr.vmem [resolvable:$true] %s252_s16 }
  0x16   : > { %p1137_p11 = pnand %p784_p9, %p1301_p1  ;;  %p871_p13 = scmp.ne.s32.totalorder %s221_s11, %s870_s17 }
  0x17   : > { %p878_p5 = scmp.lt.s32.totalorder %s221_s11, %s221_s11  ;;  %p879_p7 = scmp.lt.s32.totalorder %s870_s17, %s870_s17 }
  0x18   : > { %p861_p12 = pneg %p1137_p11 }
  0x19   : > { %p880_p9 = por %p879_p7, %p878_p5 }
  0x1a   : > { %p873_p0 = pnand %p871_p13, %p861_p12 }
  0x1c   : > { %p874_p3 = pneg %p873_p0 }
  0x1e   : > { %p881_p10 = pnand %p880_p9, %p874_p3 }
  0x20   : > { %884 = shalt.err (!%p881_p10)
}
  0x21   : > { %s1042_s18 = smov 64   ;;  %s1043_s19 = smov 4  }
  0x22   : > { %s1311_s1 = sld [smem:[#allocation15_spill]]  ;;  %s896_s22 = scalar_lea.vmem %s237_s14, 512 }
  0x23   : > { %p897_p1 = scmp.ne.s32.totalorder %s237_s14, %s896_s22  ;;  %p904_p2 = scmp.lt.s32.totalorder %s237_s14, %s237_s14 }
  0x24   : > { %p905_p6 = scmp.lt.s32.totalorder %s896_s22, %s896_s22 }
  0x25   : > { %p899_p13 = pnand %p897_p1, %p861_p12 }
  0x26   : > { %p906_p5 = por %p905_p6, %p904_p2 }
  0x27   : > { %p900_p0 = pneg %p899_p13 }
  0x28   : > { %787 = dma.hbm_to_vmem [thread:$0]  (!%p1137_p11), %s1311_s1, 256, %s221_s11, [#allocation6], %s1042_s18, %s1042_s18, %s1043_s19  }
  0x29   : > { %p907_p3 = pnand %p906_p5, %p900_p0 }
  0x2b   : > { %910 = shalt.err (!%p907_p3)
}
  0x2c   : > { %s1312_s3 = sld [smem:[#allocation16_spill]]  ;;  %s922_s10 = scalar_lea.vmem %s253_s16, 512 }
  0x2d   : > { %p923_p10 = scmp.ne.s32.totalorder %s253_s16, %s922_s10  ;;  %p930_p9 = scmp.lt.s32.totalorder %s253_s16, %s253_s16 }
  0x2e   : > { %p931_p13 = scmp.lt.s32.totalorder %s922_s10, %s922_s10 }
  0x2f   : > { %p925_p7 = pnand %p923_p10, %p861_p12 }
  0x30   : > { %p932_p4 = por %p931_p13, %p930_p9 }
  0x31   : > { %p926_p1 = pneg %p925_p7 }
  0x32   : > { %790 = dma.hbm_to_vmem [thread:$0]  (!%p1137_p11), %s1312_s3, 512, %s237_s14, [#allocation6], %s1042_s18, %s1042_s18, %s1043_s19  }
  0x33   : > { %p933_p2 = pnand %p932_p4, %p926_p1 }
  0x35   : > { %936 = shalt.err (!%p933_p2)
}
  0x36   : > { %793 = dma.hbm_to_vmem [thread:$0]  (!%p1137_p11), %s1298_s5, 512, %s253_s16, [#allocation9], %s1042_s18, %s1042_s18, %s1043_s19  }
  0x37   : > { %s1168_s14 = sadd.s32 1, %s1037_s27   ;;  %s32_s12 = sadd.s32 1, %s1033_s26 }
  0x38   : > { %s29_s15 = ssub.s32 %s1037_s27, %s1168_s14  ;;  %p39_p6 = scmp.ne.s32.totalorder %s1033_s26, %s1029_s25 }
  0x39   : > { %p30_p4 = scmp.eq.s32.totalorder %s29_s15, 0  ;;  %p40_p12 = scmp.eq.s32.totalorder %s1037_s27, 0 }
  0x3a   : > { %p805_p0 = scmp.lt.s32.totalorder %s1037_s27, 2  ;;  %p1313_p3 = scmp.eq.s32.totalorder %s1109_s28, 1 }
  0x3b   : > { %s1178_s17 = scalar_select %p30_p4, %s1033_s26, %s32_s12  }
  0x3c   : > { %p41_p5 = por %p40_p12, %p39_p6  ;;  %p1182_p10 = por %p1313_p3, %p39_p6 }
  0x3d   : > { %s269_s21 = sand.u32 1, %s1033_s26   ;;  %s696_s22 = sshll.u32 %s1037_s27, 7 }
  0x3e   : > { %s1314_s20 = scalar_select %p1182_p10, 1, 0 }
  0x3f   : > { %s695_s16 = sshll.u32 %s269_s21, 3  ;;  %s1191_s23 = scalar_lea.hbm %s1293_s0, %s696_s22 }
  0x40   : > { %s273_s29 = scalar_lea.vmem [#allocation2], %s695_s16  ;;  %p1193_p11 = pnand %p805_p0, %p41_p5 }
  0x41   : > { %s280_s10 = sshll.u32 %s273_s29, 4  ;;  %s270_s13 = scalar_lea.sflag [#allocation3], %s269_s21  ;;  %s281_s10 = int_to_ptr.vmem [resolvable:$true] %s280_s10 }
  0x42   : > { %s937_s15 = scalar_lea.hbm %s1191_s23, 128  ;;  %p939_p1 = pneg %p1193_p11 }
  0x43   : > { %p938_p7 = scmp.ne.s32.totalorder %s1191_s23, %s937_s15  ;;  %s942_s18 = scalar_lea.hbm %s1293_s0, 256 }
  0x44   : > { %p943_p2 = scmp.lt.s32.totalorder %s1191_s23, %s1293_s0  ;;  %p944_p4 = scmp.lt.s32.totalorder %s942_s18, %s937_s15 }
  0x45   : > { %p940_p9 = pnand %p939_p1, %p938_p7 }
  0x46   : > { %p945_p6 = por %p944_p4, %p943_p2 }
  0x47   : > { %p941_p13 = pneg %p940_p9 }
  0x49   : > { %p946_p12 = pnand %p945_p6, %p941_p13 }
  0x4b   : > { %949 = shalt.err (!%p946_p12)
}
  0x4c   : > { %s950_s29 = scalar_lea.vmem %s281_s10, 128  ;;  %s1044_s21 = smov [#allocation2]  }
  0x4d   : > { %p951_p0 = scmp.ne.s32.totalorder %s281_s10, %s950_s29  ;;  %s955_s1 = sshll.u32 %s1044_s21, 4  ;;  %s956_s1 = int_to_ptr.vmem [resolvable:$false] %s955_s1 }
  0x4e   : > { %s957_s3 = scalar_lea.vmem %s956_s1, 256  ;;  %p958_p7 = scmp.lt.s32.totalorder %s281_s10, %s956_s1 }
  0x4f   : > { %p953_p5 = pnand %p951_p0, %p939_p1  ;;  %p959_p9 = scmp.lt.s32.totalorder %s957_s3, %s950_s29 }
  0x51   : > { %p954_p3 = pneg %p953_p5  ;;  %p960_p10 = por %p959_p9, %p958_p7 }
  0x53   : > { %p961_p8 = pnand %p960_p10, %p954_p3 }
  0x55   : > { %964 = shalt.err (!%p961_p8)
}
  0x56   : > { %797 = dma.hbm_to_vmem [thread:$0]  (!%p1193_p11), %s1191_s23, 128, %s281_s10, %s270_s13  }
  0x57   : > { %p1316_p13 = scmp.ne.s32.totalorder %s1309_s9, 0 }
  0x58   : > { %s1214_s15 = sand.u32 (!%p1316_p13), 1, %s1029_s25   ;;  %p1317_p10 = scmp.ne.s32.totalorder (!%p1316_p13), %s1307_s30, 0 }
  0x59   : > { %289 = sbr.rel (%p1316_p13) target bundleno = 714 (0x2ca), region = 48  ;;  %s698_s12 = sshll.u32 (!%p1316_p13), %s1214_s15, 3 }
  0x5a   : > { %s292_s1 = scalar_lea.sflag (!%p1316_p13), [#allocation3], %s1214_s15  ;;  %s295_s3 = scalar_lea.vmem (!%p1316_p13), [#allocation2], %s698_s12 }
  0x5e   : > { %1008 = dma.done.wait (%p1317_p10), %s292_s1, 128  }
  0x5f   : > { %1010 = vsyncadd (%p1317_p10), %s292_s1, 4294967168  ;;  %p1318_p8 = scmp.eq.s32.totalorder %s1109_s28, 0 }
  0x61   : > { %1012 = dma.done.wait (%p1318_p8), [#allocation6], 768   ;;  %p1319_p11 = pmov %p1318_p8 }
  0x62   : > { %p1320_p1 = pmov %p1318_p8 }
  0x63   : > { %1014 = vsyncadd (%p1319_p11), [#allocation6], 4294966528 }
  0x64   : > { %1016 = dma.done.wait (%p1320_p1), [#allocation9], 512   ;;  %p1321_p2 = pmov %p1320_p1 }
  0x65   : > { %v1045_v0 = vmov 0.0   ;;  %vm1046_vm0 = vmmov 0   ;;  %v849_v1 = vld [vmem:[#allocation5 + $0x8] sm:$0xff]   ;;  %v850_v2 = vld [vmem:[#allocation5] sm:$0xff]   ;;  %v339_v3 = vld [vmem:[%s295_s3] sm:$0xff]  ;;  %vm364_vm1 = vcmask 261120  }
  0x66   : > { %1018 = vsyncadd (%p1321_p2), [#allocation9], 4294966784  ;;  %736 = vmatprep.subr.bf16.mxu0 %v1045_v0  ;;  %740 = vmatprep.mubr.msk.bf16.mxu0 %vm1046_vm0, %v1045_v0  ;;  %v851_v4 = vld [vmem:[#allocation7 + $0x18] sm:$0xff]   ;;  %v345_v5 = vpack.c.bf16 %v339_v3, %v339_v3  ;;  %v852_v6 = vld [vmem:[#allocation7 + $0x10] sm:$0xff]   ;;  %vm448_vm2 = vcmask 523264   ;;  %s720_s22 = sshll.u32 %s1109_s28, 7 }
  0x67   : > { %744 = vmatprep.subr.bf16.mxu1 %v1045_v0  ;;  %752 = vmatprep.mubr.msk.bf16.mxu1 %vm1046_vm0, %v1045_v0  ;;  %v853_v7 = vld [vmem:[#allocation7 + $0x8] sm:$0xff]   ;;  %v854_v8 = vld [vmem:[#allocation7] sm:$0xff]   ;;  %v855_v9 = vld [vmem:[#allocation8 + $0x18] sm:$0xff]   ;;  %s337_s18 = scalar_lea.vmem [#allocation10], %s698_s12  ;;  %s1250_s21 = scalar_lea.hbm %s1300_s7, %s720_s22 }
  0x68   : > { %737 = vmatpush3.bf16.msra.mxu0 %v849_v1  ;;  %745 = vmatpush3.bf16.msra.mxu1 %v851_v4  ;;  %v856_v10 = vld [vmem:[#allocation8 + $0x10] sm:$0xff]   ;;  %v857_v11 = vld [vmem:[#allocation8 + $0x8] sm:$0xff]   ;;  %v703_v12 = vld [vmem:[%s1295_s2] ss:$0 sm:$0xff]  ;;  %s590_s19 = sshll.u32 %s337_s18, 4  ;;  %s577_s1 = scalar_lea.sflag [#allocation4], %s1214_s15  ;;  %s1252_s19 = int_to_ptr.vmem [resolvable:$true] %s590_s19 }
  0x69   : > { %738 = vmatprep.subr.bf16.mxu0 %v1045_v0  ;;  %746 = vmatprep.subr.bf16.mxu1 %v1045_v0  ;;  %v858_v19 = vld [vmem:[#allocation8] sm:$0xff]   ;;  %s965_s28 = scalar_lea.vmem %s1252_s19, 128  ;;  %p1322_p6 = scmp.ne.s32.totalorder %s1314_s20, 0 }
  0x6a   : > { %v707_v20 = vld [vmem:[%s1297_s4] ss:$0 sm:$0xff]  ;;  %p966_p4 = scmp.ne.s32.totalorder %s1252_s19, %s965_s28  ;;  %s1047_s12 = smov [#allocation10]  }
  0x6b   : > { %v713_v27 = vld [vmem:[%s1299_s6] ss:$0 sm:$0xff]  ;;  %s969_s3 = sshll.u32 %s1047_s12, 4  ;;  %s970_s3 = int_to_ptr.vmem [resolvable:$false] %s969_s3 }
  0x6c   : > { %739 = vmatpush3.bf16.msra.mxu0 %v850_v2  ;;  %747 = vmatpush3.bf16.msra.mxu1 %v852_v6  ;;  %p967_p12 = pnand %p966_p4, %p1322_p6  ;;  %s971_s30 = scalar_lea.vmem %s970_s3, 256 }
  0x6d   : > { %756 = vmatprep.subr.bf16.mxu0 %v1045_v0  ;;  %748 = vmatprep.subr.bf16.mxu1 %v1045_v0  ;;  %p972_p5 = scmp.lt.s32.totalorder %s1252_s19, %s970_s3  ;;  %p973_p3 = scmp.lt.s32.totalorder %s971_s30, %s965_s28 }
  0x6e   : > { %p968_p0 = pneg %p967_p12 }
  0x6f   : > { %741 = vmatmul.mubr.msk.bf16.vlgmr.msra.gmra.mxu0 %vm364_vm1, %v345_v5  ;;  %p974_p7 = por %p973_p3, %p972_p5 }
  0x70   : > { %764 = vmatprep.mubr.msk.bf16.mxu0 %vm1046_vm0, %v1045_v0  ;;  %749 = vmatpush3.bf16.msra.mxu1 %v853_v7 }
  0x71   : > { %750 = vmatprep.subr.bf16.mxu1 %v1045_v0  ;;  %757 = vmatpush3.bf16.msra.mxu0 %v855_v9  ;;  %p975_p9 = pnand %p974_p7, %p968_p0 }
  0x72   : > { %758 = vmatprep.subr.bf16.mxu0 %v1045_v0 }
  0x74   : > { %751 = vmatpush3.bf16.msra.mxu1 %v854_v8 }
  0x75   : > { %759 = vmatpush3.bf16.msra.mxu0 %v856_v10 }
  0x76   : > { %760 = vmatprep.subr.bf16.mxu0 %v1045_v0 }
  0x79   : > { %761 = vmatpush3.bf16.msra.mxu0 %v857_v11 }
  0x7a   : > { %762 = vmatprep.subr.bf16.mxu0 %v1045_v0 }
  0x7d   : > { %763 = vmatpush3.bf16.msra.mxu0 %v858_v19 }
 0x12f   : > { %v402_v13 = vpop.f32.mrf.mxu0 }
 0x130   : > { %v403_v14 = vadd.f32 %v703_v12, %v402_v13 }
 0x131   : > { %v742_v15 = vpop.f32.mrf.mxu0 }
 0x132   : > { %v417_v16 = vpack.c.bf16 %v403_v14, %v403_v14 }
 0x133   : > { %v405_v17 = vpop.f32.mrf.mxu0 }
 0x134   : > { %753 = vmatmul.mubr.msk.bf16.vlgmr.msra.gmra.mxu1 %vm448_vm2, %v417_v16 }
 0x135   : > { %v743_v18 = vpop.f32.mrf.mxu0 }
 0x1f4   : > { %v486_v21 = vpop.f32.mrf.mxu1 }
 0x1f5   : > { %v487_v22 = vadd.f32 %v707_v20, %v486_v21 }
 0x1f6   : > { %v754_v23 = vpop.f32.mrf.mxu1 }
 0x1f7   : > { %v501_v24 = vpack.c.bf16 %v487_v22, %v487_v22 }
 0x1f8   : > { %v489_v25 = vpop.f32.mrf.mxu1 }
 0x1f9   : > { %765 = vmatmul.mubr.msk.bf16.vlgmr.msra.gmra.mxu0 %vm448_vm2, %v501_v24 }
 0x1fa   : > { %v755_v26 = vpop.f32.mrf.mxu1 }
 0x2b9   : > { %v569_v28 = vpop.f32.mrf.mxu0 }
 0x2ba   : > { %v570_v29 = vadd.f32 %v713_v27, %v569_v28 }
 0x2bb   : > { %v766_v30 = vpop.f32.mrf.mxu0 }
 0x2bc   : > { %575 = vst [vmem:[%s337_s18] sm:$0xff] %v570_v29 }
 0x2bd   : > { %v572_v31 = vpop.f32.mrf.mxu0 }
 0x2be   : > { %978 = shalt.err (!%p975_p9)
}
 0x2bf   : > { %s979_s9 = scalar_lea.hbm %s1250_s21, 128  ;;  %s983_s10 = scalar_lea.hbm %s1300_s7, 256 }
 0x2c0   : > { %p980_p13 = scmp.ne.s32.totalorder %s1250_s21, %s979_s9  ;;  %p984_p11 = scmp.lt.s32.totalorder %s1250_s21, %s1300_s7 }
 0x2c1   : > { %p985_p1 = scmp.lt.s32.totalorder %s983_s10, %s979_s9 }
 0x2c2   : > { %p981_p10 = pnand %p980_p13, %p1322_p6 }
 0x2c3   : > { %p986_p2 = por %p985_p1, %p984_p11 }
 0x2c4   : > { %p982_p8 = pneg %p981_p10 }
 0x2c6   : > { %p987_p4 = pnand %p986_p2, %p982_p8 }
 0x2c8   : > { %990 = shalt.err (!%p987_p4)
}
 0x2c9   : > { %782 = dma.vmem_to_hbm [thread:$0]  (%p1322_p6), %s1252_s19, 128, %s1250_s21, %s577_s1   ;;  %v767_v32 = vpop.f32.mrf.mxu0 }
 0x2ca PF: > { %s602_s22 = sand.u32 1, %s1025_s24   ;;  %p1323_p12 = scmp.ne.s32.totalorder %s1308_s8, 0 }
 0x2cb   : > { %p1324_p0 = scmp.ge.s32.totalorder %s1037_s27, 2  ;;  %s603_s18 = scalar_lea.sflag [#allocation4], %s602_s22 }
 0x2cd   : > { %p799_p5 = pnand %p1324_p0, %p1323_p12 }
 0x2cf   : > { %p800_p3 = pneg %p799_p5 }
 0x2d1   : > { %1020 = dma.done.wait (%p800_p3), %s603_s18, 128  }
 0x2d2   : > { %1022 = vsyncadd (%p800_p3), %s603_s18, 4294967168  ;;  %p22_p7 = scmp.ge.s32.totalorder %s1168_s14, 4   ;;  %s1325_s24 = smov %s1029_s25 }
 0x2d3   : > { %s1326_s25 = smov %s1033_s26  ;;  %s1327_s26 = smov %s1178_s17 }
 0x2d4   : > { %s1328_s27 = smov %s1168_s14  ;;  %24 = sbr.rel (!%p22_p7) target bundleno = 10 (0xa), region = 105 }
 0x2d9   :  { %608 = vsyncpa [#allocation3], 1 }
 0x2da   :  { %610 = vsyncpa [#allocation3 + $0x1], 1 }
 0x2db   :  { %611 = vsyncpa [#allocation6], 1 }
 0x2dc   :  { %612 = vsyncpa [#allocation9], 1 }
 0x2dd   :  { %613 = vsyncpa [#allocation4], 1 }
 0x2de   :  { %615 = vsyncpa [#allocation4 + $0x1], 1 }

</bundles_post_ra>
